<compile_context>
chip_gen: v5e
topology: v5e:2x2
jax: 0.10.0
libtpu: 0.0.40
codegen_flags: <defaults>
</compile_context>

<pallas_src>
import jax
import jax.numpy as jnp
from jax.experimental import pallas as pl
from jax.experimental.pallas import tpu as pltpu


def _decoder_kernel(
    emb_ref, enc_ref, h_ref,          # activations: (1,H), (L,H), (1,H)
    wa_ref,                           # (2H, H)  attn Linear(2H->H) transposed; rows [:H]=hidden part, [H:]=enc part
    avb_ref,                          # (2, H)   row 0 = attn bias, row 1 = attention vector v
    wih_ref,                          # (2H, 3H) GRU input->gates, rows [:H]=emb part, [H:]=context part; cols [r|z|n]
    whh_ref,                          # (H, 3H)  GRU hidden->gates; cols [r|z|n]
    b_ref,                            # (2, 3H)  row 0 = b_ih, row 1 = b_hh (both ordered [r|z|n])
    wout_ref, bout_ref,               # (2H, V), (1, V)
    out_ref, hnew_ref, attn_ref,      # outputs: (1,V), (1,H), (1,L)
):
    H = h_ref.shape[1]

    hid = h_ref[...]          # (1, H)   last_hidden[-1]
    enc = enc_ref[...]        # (L, H)   encoder outputs (batch squeezed)
    emb = emb_ref[...]        # (1, H)   embedded word (dropout == identity in eval)

    # ---- Attn('concat'): energy_l = Linear_{2H->H}([hid ; enc_l]), score_l = v . energy_l
    # static ref-view slices (zero-cost), not slices of a loaded value
    e_hid = jnp.dot(hid, wa_ref[:H, :], preferred_element_type=jnp.float32)   # (1, H)
    e_enc = jnp.dot(enc, wa_ref[H:, :], preferred_element_type=jnp.float32)   # (L, H)
    energy = e_hid + e_enc + avb_ref[0:1, :]                                  # (L, H)
    v_row = avb_ref[1:2, :]                                                   # (1, H)

    # lane-dense scores: contract over H -> (1, L)
    scores = jnp.einsum('oh,lh->ol', v_row, energy,
                        preferred_element_type=jnp.float32)                   # (1, L)

    # softmax over L (lane axis), stable; divide via EUP reciprocal
    m = jnp.max(scores, axis=1, keepdims=True)
    e = jnp.exp(scores - m)
    w = e * pl.reciprocal(jnp.sum(e, axis=1, keepdims=True), approx=True)     # (1, L)
    attn_ref[...] = w

    # ---- context = attn_weights @ encoder_outputs  (MXU matmul)  -> (1, H)
    context = jnp.dot(w, enc, preferred_element_type=jnp.float32)             # (1, H)

    # ---- GRU cell on rnn_input = [embedded ; context]  (fused gate matmuls)
    rnn_in = jnp.concatenate([emb, context], axis=1)                          # (1, 2H)
    gi = jnp.dot(rnn_in, wih_ref[...], preferred_element_type=jnp.float32) + b_ref[0:1, :]  # (1, 3H)
    gh = jnp.dot(hid, whh_ref[...], preferred_element_type=jnp.float32) + b_ref[1:2, :]     # (1, 3H)

    r = jax.nn.sigmoid(gi[:, :H] + gh[:, :H])
    z = jax.nn.sigmoid(gi[:, H:2 * H] + gh[:, H:2 * H])
    n = jnp.tanh(gi[:, 2 * H:] + r * gh[:, 2 * H:])
    h_new = (1.0 - z) * n + z * hid                                           # (1, H)
    hnew_ref[...] = h_new

    # ---- output head: single Linear_{2H->V}([h_new ; context]) then log_softmax over V
    hc = jnp.concatenate([h_new, context], axis=1)                            # (1, 2H)
    logits = jnp.dot(hc, wout_ref[...], preferred_element_type=jnp.float32) + bout_ref[...]  # (1, V)
    lmax = jnp.max(logits, axis=1, keepdims=True)
    lse = jnp.log(jnp.sum(jnp.exp(logits - lmax), axis=1, keepdims=True)) + lmax
    out_ref[...] = logits - lse


def init_params(key, hidden_size, output_size):
    """Deterministic synthetic parameters (PyTorch weight shape conventions)."""
    H, V = hidden_size, output_size
    ks = jax.random.split(key, 10)
    s = 0.1
    return dict(
        embedding=jax.random.normal(ks[0], (V, H), jnp.float32) * s,
        attn_w=jax.random.normal(ks[1], (H, 2 * H), jnp.float32) * s,   # Linear(2H -> H), (out,in)
        attn_b=jax.random.normal(ks[2], (H,), jnp.float32) * s,
        attn_v=jax.random.normal(ks[3], (1, H), jnp.float32) * s,
        gru_w_ih=jax.random.normal(ks[4], (3 * H, 2 * H), jnp.float32) * s,  # rows [r; z; n]
        gru_w_hh=jax.random.normal(ks[5], (3 * H, H), jnp.float32) * s,
        gru_b_ih=jax.random.normal(ks[6], (3 * H,), jnp.float32) * s,
        gru_b_hh=jax.random.normal(ks[7], (3 * H,), jnp.float32) * s,
        out_w=jax.random.normal(ks[8], (V, 2 * H), jnp.float32) * s,    # Linear(2H -> V), (out,in)
        out_b=jax.random.normal(ks[9], (V,), jnp.float32) * s,
    )


def pack_params(params):
    """One-time packing/transposition into kernel layout (outside the per-step jit)."""
    H = params["attn_w"].shape[0]
    V = params["out_w"].shape[0]
    wih, whh = params["gru_w_ih"], params["gru_w_hh"]
    # pack the three gates along the lane axis, column order [r | z | n]
    w_ih_pack = jnp.concatenate([wih[:H].T, wih[H:2 * H].T, wih[2 * H:].T], axis=1)   # (2H, 3H)
    w_hh_pack = jnp.concatenate([whh[:H].T, whh[H:2 * H].T, whh[2 * H:].T], axis=1)   # (H, 3H)
    b_pack = jnp.stack([params["gru_b_ih"], params["gru_b_hh"]], axis=0)              # (2, 3H)
    attn_vb = jnp.concatenate(
        [params["attn_b"].reshape(1, H), params["attn_v"].reshape(1, H)], axis=0)     # (2, H)
    # TODO(synk): for v6e/v5e, store the packed matmul weights in bfloat16 to halve DMA bytes
    # (kept f32 here for exact parity / lowering safety).
    return dict(
        embedding=params["embedding"],
        wa_pack=params["attn_w"].T,        # (2H, H)
        attn_vb=attn_vb,                   # (2, H)
        w_ih_pack=w_ih_pack,               # (2H, 3H)
        w_hh_pack=w_hh_pack,               # (H, 3H)
        b_pack=b_pack,                     # (2, 3H)
        wout=params["out_w"].T,            # (2H, V)
        bout=params["out_b"].reshape(1, V),
    )


@jax.jit
def bahdanau_decoder_forward(packed, word_input, last_hidden, encoder_outputs):
    """word_input: int32 scalar; last_hidden: (1,1,H); encoder_outputs: (L,1,H)."""
    H = last_hidden.shape[-1]
    L = encoder_outputs.shape[0]
    V = packed["wout"].shape[1]

    # glue: embedding lookup; dropout is identity in eval mode
    # TODO(synk): training-mode dropout (RNG mask) not implemented in-kernel.
    emb = packed["embedding"][word_input].reshape(1, H)
    hid = last_hidden[-1]                          # (1, H)
    enc = encoder_outputs[:, 0, :]                 # (L, H)

    # TODO(synk): for large V (e.g. v7x 64 MiB VMEM) tile V with a grid axis +
    # pipelined BlockSpecs for wout/bout/out; unnecessary at these shapes.
    # TODO(synk): multi-step decode should carry h in VMEM scratch across a grid
    # of steps so weight DMAs are amortized over the whole sequence.
    vmem = pl.BlockSpec(memory_space=pltpu.MemorySpace.VMEM)   # whole-array block in VMEM
    out_logp, h_new, attn_row = pl.pallas_call(
        _decoder_kernel,
        out_shape=(
            jax.ShapeDtypeStruct((1, V), jnp.float32),
            jax.ShapeDtypeStruct((1, H), jnp.float32),
            jax.ShapeDtypeStruct((1, L), jnp.float32),
        ),
        in_specs=[vmem] * 10,
        out_specs=(vmem, vmem, vmem),
    )(emb, enc, hid,
      packed["wa_pack"], packed["attn_vb"],
      packed["w_ih_pack"], packed["w_hh_pack"], packed["b_pack"],
      packed["wout"], packed["bout"])

    output = out_logp                              # (batch=1, output_size)  log-probs
    hidden = h_new.reshape(1, 1, H)                # (n_layers=1, batch=1, H)
    attn_weights = attn_row.reshape(1, 1, L)       # (batch=1, 1, L)
    return output, hidden, attn_weights


if __name__ == "__main__":
    HIDDEN, VOCAB, SEQ = 32, 16, 8
    key = jax.random.PRNGKey(0)
    k_params, k_enc, k_hid = jax.random.split(key, 3)

    params = init_params(k_params, HIDDEN, VOCAB)
    packed = pack_params(params)                   # one-time packing outside the per-step jit

    word_input = jnp.array(3, dtype=jnp.int32)                                  # scalar token id
    last_hidden = jax.random.normal(k_hid, (1, 1, HIDDEN), jnp.float32)         # (n_layers, B, H)
    encoder_outputs = jax.random.normal(k_enc, (SEQ, 1, HIDDEN), jnp.float32)   # (L, B, H)

    output, hidden, attn_weights = bahdanau_decoder_forward(
        packed, word_input, last_hidden, encoder_outputs)
    jax.block_until_ready((output, hidden, attn_weights))

    assert output.shape == (1, VOCAB)
    assert hidden.shape == (1, 1, HIDDEN)
    assert attn_weights.shape == (1, 1, SEQ)
    print("KERNEL_OK")
</pallas_src>

<mosaic_0001>
module attributes {stable_mosaic.version = 11 : i64} {
  func.func @_decoder_kernel(%arg0: memref<1x32xf32, #tpu.memory_space<vmem>>, %arg1: memref<8x32xf32, #tpu.memory_space<vmem>>, %arg2: memref<1x32xf32, #tpu.memory_space<vmem>>, %arg3: memref<64x32xf32, #tpu.memory_space<vmem>>, %arg4: memref<2x32xf32, #tpu.memory_space<vmem>>, %arg5: memref<64x96xf32, #tpu.memory_space<vmem>>, %arg6: memref<32x96xf32, #tpu.memory_space<vmem>>, %arg7: memref<2x96xf32, #tpu.memory_space<vmem>>, %arg8: memref<64x16xf32, #tpu.memory_space<vmem>>, %arg9: memref<1x16xf32, #tpu.memory_space<vmem>>, %arg10: memref<1x16xf32, #tpu.memory_space<vmem>>, %arg11: memref<1x32xf32, #tpu.memory_space<vmem>>, %arg12: memref<1x8xf32, #tpu.memory_space<vmem>>) attributes {dimension_semantics = [], scalar_prefetch = 0 : i64, scratch_operands = 0 : i64, tpu.core_type = #tpu.core_type<tc>} {
    %c0 = arith.constant 0 : index
    %c0_0 = arith.constant 0 : index
    %0 = vector.load %arg2[%c0, %c0_0] : memref<1x32xf32, #tpu.memory_space<vmem>>, vector<1x32xf32>
    %c0_1 = arith.constant 0 : index
    %c0_2 = arith.constant 0 : index
    %1 = vector.load %arg1[%c0_1, %c0_2] : memref<8x32xf32, #tpu.memory_space<vmem>>, vector<8x32xf32>
    %c0_3 = arith.constant 0 : index
    %c0_4 = arith.constant 0 : index
    %2 = vector.load %arg0[%c0_3, %c0_4] : memref<1x32xf32, #tpu.memory_space<vmem>>, vector<1x32xf32>
    %c0_5 = arith.constant 0 : index
    %c0_6 = arith.constant 0 : index
    %3 = vector.load %arg3[%c0_5, %c0_6] : memref<64x32xf32, #tpu.memory_space<vmem>>, vector<32x32xf32>
    %cst = arith.constant dense<0.000000e+00> : vector<1x32xf32>
    %4 = tpu.matmul %0, %3, %cst {dimension_numbers = #tpu.dot_dimension_numbers<[1], [0], [0], [1], [0, 0, 1, 1], [], []>} : vector<1x32xf32>, vector<32x32xf32>, vector<1x32xf32> -> vector<1x32xf32>
    %c32 = arith.constant 32 : index
    %c0_7 = arith.constant 0 : index
    %5 = vector.load %arg3[%c32, %c0_7] : memref<64x32xf32, #tpu.memory_space<vmem>>, vector<32x32xf32>
    %cst_8 = arith.constant dense<0.000000e+00> : vector<8x32xf32>
    %6 = tpu.matmul %1, %5, %cst_8 {dimension_numbers = #tpu.dot_dimension_numbers<[1], [0], [0], [1], [0, 0, 1, 1], [], []>} : vector<8x32xf32>, vector<32x32xf32>, vector<8x32xf32> -> vector<8x32xf32>
    %7 = vector.broadcast %4 : vector<1x32xf32> to vector<8x32xf32>
    %8 = arith.addf %7, %6 : vector<8x32xf32>
    %c0_9 = arith.constant 0 : index
    %c0_10 = arith.constant 0 : index
    %9 = vector.load %arg4[%c0_9, %c0_10] : memref<2x32xf32, #tpu.memory_space<vmem>>, vector<1x32xf32>
    %10 = vector.broadcast %9 : vector<1x32xf32> to vector<8x32xf32>
    %11 = arith.addf %8, %10 : vector<8x32xf32>
    %c1 = arith.constant 1 : index
    %c0_11 = arith.constant 0 : index
    %12 = vector.load %arg4[%c1, %c0_11] : memref<2x32xf32, #tpu.memory_space<vmem>>, vector<1x32xf32>
    "tpu.trace_start"() <{level = 10 : i32, message = "oh,lh->ol"}> : () -> ()
    %cst_12 = arith.constant dense<0.000000e+00> : vector<1x8xf32>
    %13 = tpu.matmul %12, %11, %cst_12 {dimension_numbers = #tpu.dot_dimension_numbers<[1], [1], [0], [0], [0, 0, 1, 0], [], []>} : vector<1x32xf32>, vector<8x32xf32>, vector<1x8xf32> -> vector<1x8xf32>
    "tpu.trace_stop"() : () -> ()
    %cst_13 = arith.constant dense<0xFF800000> : vector<1xf32>
    %14 = vector.multi_reduction <maximumf>, %13, %cst_13 [1] : vector<1x8xf32> to vector<1xf32>
    %15 = vector.shape_cast %14 : vector<1xf32> to vector<1x1xf32>
    %16 = vector.broadcast %15 : vector<1x1xf32> to vector<1x8xf32>
    %17 = arith.subf %13, %16 : vector<1x8xf32>
    %18 = math.exp %17 : vector<1x8xf32>
    %cst_14 = arith.constant dense<0.000000e+00> : vector<1xf32>
    %19 = vector.multi_reduction <add>, %18, %cst_14 [1] : vector<1x8xf32> to vector<1xf32>
    %20 = vector.shape_cast %19 : vector<1xf32> to vector<1x1xf32>
    %21 = tpu.reciprocal %20 {approx = true} : vector<1x1xf32> -> vector<1x1xf32>
    %22 = vector.broadcast %21 : vector<1x1xf32> to vector<1x8xf32>
    %23 = arith.mulf %18, %22 : vector<1x8xf32>
    %c0_15 = arith.constant 0 : index
    %c0_16 = arith.constant 0 : index
    %24 = vector.load %arg12[%c0_15, %c0_16] : memref<1x8xf32, #tpu.memory_space<vmem>>, vector<1x8xf32>
    tpu.vector_store %arg12[%c0_15, %c0_16], %23 {strides = array<i32>} : memref<1x8xf32, #tpu.memory_space<vmem>>, vector<1x8xf32>,
    %cst_17 = arith.constant dense<0.000000e+00> : vector<1x32xf32>
    %25 = tpu.matmul %23, %1, %cst_17 {dimension_numbers = #tpu.dot_dimension_numbers<[1], [0], [0], [1], [0, 0, 1, 1], [], []>} : vector<1x8xf32>, vector<8x32xf32>, vector<1x32xf32> -> vector<1x32xf32>
    %26 = tpu.concatenate %2, %25 in 1 : vector<1x32xf32>, vector<1x32xf32> -> vector<1x64xf32>
    %c0_18 = arith.constant 0 : index
    %c0_19 = arith.constant 0 : index
    %27 = vector.load %arg5[%c0_18, %c0_19] : memref<64x96xf32, #tpu.memory_space<vmem>>, vector<64x96xf32>
    %cst_20 = arith.constant dense<0.000000e+00> : vector<1x96xf32>
    %28 = tpu.matmul %26, %27, %cst_20 {dimension_numbers = #tpu.dot_dimension_numbers<[1], [0], [0], [1], [0, 0, 1, 1], [], []>} : vector<1x64xf32>, vector<64x96xf32>, vector<1x96xf32> -> vector<1x96xf32>
    %c0_21 = arith.constant 0 : index
    %c0_22 = arith.constant 0 : index
    %29 = vector.load %arg7[%c0_21, %c0_22] : memref<2x96xf32, #tpu.memory_space<vmem>>, vector<1x96xf32>
    %30 = arith.addf %28, %29 : vector<1x96xf32>
    %c0_23 = arith.constant 0 : index
    %c0_24 = arith.constant 0 : index
    %31 = vector.load %arg6[%c0_23, %c0_24] : memref<32x96xf32, #tpu.memory_space<vmem>>, vector<32x96xf32>
    %cst_25 = arith.constant dense<0.000000e+00> : vector<1x96xf32>
    %32 = tpu.matmul %0, %31, %cst_25 {dimension_numbers = #tpu.dot_dimension_numbers<[1], [0], [0], [1], [0, 0, 1, 1], [], []>} : vector<1x32xf32>, vector<32x96xf32>, vector<1x96xf32> -> vector<1x96xf32>
    %c1_26 = arith.constant 1 : index
    %c0_27 = arith.constant 0 : index
    %33 = vector.load %arg7[%c1_26, %c0_27] : memref<2x96xf32, #tpu.memory_space<vmem>>, vector<1x96xf32>
    %34 = arith.addf %32, %33 : vector<1x96xf32>
    %35 = vector.extract_strided_slice %30 {offsets = [0, 0], sizes = [1, 32], strides = [1, 1]} : vector<1x96xf32> to vector<1x32xf32>
    %36 = vector.extract_strided_slice %34 {offsets = [0, 0], sizes = [1, 32], strides = [1, 1]} : vector<1x96xf32> to vector<1x32xf32>
    %37 = arith.addf %35, %36 : vector<1x32xf32>
    %38 = arith.negf %37 : vector<1x32xf32>
    %39 = math.exp %38 : vector<1x32xf32>
    %cst_28 = arith.constant 1.000000e+00 : f32
    %40 = vector.broadcast %cst_28 : f32 to vector<1x32xf32>
    %41 = arith.addf %40, %39 : vector<1x32xf32>
    %42 = arith.divf %40, %41 : vector<1x32xf32>
    %43 = vector.extract_strided_slice %30 {offsets = [0, 32], sizes = [1, 32], strides = [1, 1]} : vector<1x96xf32> to vector<1x32xf32>
    %44 = vector.extract_strided_slice %34 {offsets = [0, 32], sizes = [1, 32], strides = [1, 1]} : vector<1x96xf32> to vector<1x32xf32>
    %45 = arith.addf %43, %44 : vector<1x32xf32>
    %46 = arith.negf %45 : vector<1x32xf32>
    %47 = math.exp %46 : vector<1x32xf32>
    %cst_29 = arith.constant 1.000000e+00 : f32
    %48 = vector.broadcast %cst_29 : f32 to vector<1x32xf32>
    %49 = arith.addf %48, %47 : vector<1x32xf32>
    %50 = arith.divf %48, %49 : vector<1x32xf32>
    %51 = vector.extract_strided_slice %30 {offsets = [0, 64], sizes = [1, 32], strides = [1, 1]} : vector<1x96xf32> to vector<1x32xf32>
    %52 = vector.extract_strided_slice %34 {offsets = [0, 64], sizes = [1, 32], strides = [1, 1]} : vector<1x96xf32> to vector<1x32xf32>
    %53 = arith.mulf %42, %52 : vector<1x32xf32>
    %54 = arith.addf %51, %53 : vector<1x32xf32>
    %55 = math.tanh %54 : vector<1x32xf32>
    %cst_30 = arith.constant 1.000000e+00 : f32
    %56 = vector.broadcast %cst_30 : f32 to vector<1x32xf32>
    %57 = arith.subf %56, %50 : vector<1x32xf32>
    %58 = arith.mulf %57, %55 : vector<1x32xf32>
    %59 = arith.mulf %50, %0 : vector<1x32xf32>
    %60 = arith.addf %58, %59 : vector<1x32xf32>
    %c0_31 = arith.constant 0 : index
    %c0_32 = arith.constant 0 : index
    %61 = vector.load %arg11[%c0_31, %c0_32] : memref<1x32xf32, #tpu.memory_space<vmem>>, vector<1x32xf32>
    tpu.vector_store %arg11[%c0_31, %c0_32], %60 {strides = array<i32>} : memref<1x32xf32, #tpu.memory_space<vmem>>, vector<1x32xf32>,
    %62 = tpu.concatenate %60, %25 in 1 : vector<1x32xf32>, vector<1x32xf32> -> vector<1x64xf32>
    %c0_33 = arith.constant 0 : index
    %c0_34 = arith.constant 0 : index
    %63 = vector.load %arg8[%c0_33, %c0_34] : memref<64x16xf32, #tpu.memory_space<vmem>>, vector<64x16xf32>
    %cst_35 = arith.constant dense<0.000000e+00> : vector<1x16xf32>
    %64 = tpu.matmul %62, %63, %cst_35 {dimension_numbers = #tpu.dot_dimension_numbers<[1], [0], [0], [1], [0, 0, 1, 1], [], []>} : vector<1x64xf32>, vector<64x16xf32>, vector<1x16xf32> -> vector<1x16xf32>
    %c0_36 = arith.constant 0 : index
    %c0_37 = arith.constant 0 : index
    %65 = vector.load %arg9[%c0_36, %c0_37] : memref<1x16xf32, #tpu.memory_space<vmem>>, vector<1x16xf32>
    %66 = arith.addf %64, %65 : vector<1x16xf32>
    %cst_38 = arith.constant dense<0xFF800000> : vector<1xf32>
    %67 = vector.multi_reduction <maximumf>, %66, %cst_38 [1] : vector<1x16xf32> to vector<1xf32>
    %68 = vector.shape_cast %67 : vector<1xf32> to vector<1x1xf32>
    %69 = vector.broadcast %68 : vector<1x1xf32> to vector<1x16xf32>
    %70 = arith.subf %66, %69 : vector<1x16xf32>
    %71 = math.exp %70 : vector<1x16xf32>
    %cst_39 = arith.constant dense<0.000000e+00> : vector<1xf32>
    %72 = vector.multi_reduction <add>, %71, %cst_39 [1] : vector<1x16xf32> to vector<1xf32>
    %73 = vector.shape_cast %72 : vector<1xf32> to vector<1x1xf32>
    %74 = math.log %73 : vector<1x1xf32>
    %75 = arith.addf %74, %68 : vector<1x1xf32>
    %76 = vector.broadcast %75 : vector<1x1xf32> to vector<1x16xf32>
    %77 = arith.subf %66, %76 : vector<1x16xf32>
    %c0_40 = arith.constant 0 : index
    %c0_41 = arith.constant 0 : index
    %78 = vector.load %arg10[%c0_40, %c0_41] : memref<1x16xf32, #tpu.memory_space<vmem>>, vector<1x16xf32>
    tpu.vector_store %arg10[%c0_40, %c0_41], %77 {strides = array<i32>} : memref<1x16xf32, #tpu.memory_space<vmem>>, vector<1x16xf32>,
    return
  }
}

</mosaic_0001>

<bundles_post_ra>
// kernel: bahdanau_decoder_forward.1
= control target key start
LH: loop header
LB: loop body
LE: loop exit
PB: predicated region body
PF: predicated region fallthrough
CT: control target
= control target key end

     0   :  { %18 = vsyncpa [#allocation3], 0  ;;  %s690_s0 = inlined_call_operand.vmem [shape: f32[1,32], index: 0, kind: input, shape index: {}]   ;;  %s691_s1 = inlined_call_operand.vmem [shape: f32[8,32], index: 1, kind: input, shape index: {}]   ;;  %s692_s2 = inlined_call_operand.vmem [shape: f32[1,32], index: 2, kind: input, shape index: {}]   ;;  %s693_s3 = inlined_call_operand.vmem [shape: f32[64,32], index: 3, kind: input, shape index: {}]   ;;  %s694_s4 = inlined_call_operand.vmem [shape: f32[2,32], index: 4, kind: input, shape index: {}]   ;;  %s695_s5 = inlined_call_operand.vmem [shape: f32[64,96], index: 5, kind: input, shape index: {}]   ;;  %s696_s6 = inlined_call_operand.vmem [shape: f32[32,96], index: 6, kind: input, shape index: {}]   ;;  %s697_s7 = inlined_call_operand.vmem [shape: f32[2,96], index: 7, kind: input, shape index: {}]   ;;  %s698_s8 = inlined_call_operand.vmem [shape: f32[64,16], index: 8, kind: input, shape index: {}]   ;;  %s699_s9 = inlined_call_operand.vmem [shape: f32[1,16], index: 9, kind: input, shape index: {}]   ;;  %s700_s10 = inlined_call_operand.hbm [shape: f32[1,16], index: 10, kind: output, shape index: {0}]   ;;  %s701_s11 = inlined_call_operand.hbm [shape: f32[1,32], index: 11, kind: output, shape index: {1}]   ;;  %s702_s12 = inlined_call_operand.hbm [shape: f32[1,8], index: 12, kind: output, shape index: {2}]  }
   0x1   :  { %v46_v0 = vld [vmem:[%s693_s3 + $0x18] sm:$0xff]  ;;  %v45_v1 = vld [vmem:[%s693_s3 + $0x10] sm:$0xff]  ;;  %v44_v2 = vld [vmem:[%s693_s3 + $0x8] sm:$0xff] }
   0x2   :  { %63 = vmatpush.msra.mxu1 %v46_v0  ;;  %v41_v3 = vld [vmem:[%s691_s1] sm:$0xff] }
   0x4   :  { %64 = vmatpush.msra.mxu1 %v45_v1 }
   0x5   :  { %19 = vsyncpa [#allocation5], 0  ;;  %v43_v4 = vld [vmem:[%s693_s3] sm:$0xff]  ;;  %162 = vmatpush.msra.mxu3 %v41_v3  ;;  %vm47_vm0 = vcmask 261120   ;;  %v74_v6 = vld [vmem:[%s693_s3 + $0x38] sm:$0xff]  ;;  %vm130_vm1 = vcmask 57344  }
   0x6   :  { %65 = vmatpush.msra.mxu1 %v44_v2  ;;  %v569_v5 = vld [vmem:[%s692_s2] sm:$0x1]  ;;  %v73_v7 = vld [vmem:[%s693_s3 + $0x30] sm:$0xff]  ;;  %v72_v8 = vld [vmem:[%s693_s3 + $0x28] sm:$0xff]  ;;  %vm143_vm2 = vcmask 64512   ;;  %s480_s24 = smov 32  }
   0x7   :  { %v71_v9 = vld [vmem:[%s693_s3 + $0x20] sm:$0xff]  ;;  %v208_v27 = vld [vmem:[%s696_s6 + $0x18] sm:$0xff]  ;;  %v207_v28 = vld [vmem:[%s696_s6 + $0x10] sm:$0xff]  ;;  %v267_v40 = vperm.slane %v569_v5, 0  ;;  %s481_s27 = smov 64   ;;  %vm181_vm3 = vcmask 523264  }
   0x8   :  { %66 = vmatpush.msra.mxu1 %v43_v4  ;;  %v389_v12 = vld [vmem:[%s694_s4] ss:$0 sm:$0xff]  ;;  %v103_v16 = vld [vmem:[%s694_s4 + $0x1] sm:$0x1]  ;;  %v179_v29 = vld [vmem:[%s695_s5 + $0x38] sm:$0xff]  ;;  %vm277_vm8 = vcmask 253952  }
   0x9   :  { %374 = vmatmul.msk.f32.vlgmr.msra.gmra.mxu1 %vm47_vm0, %v569_v5  ;;  %v178_v30 = vld [vmem:[%s695_s5 + $0x30] sm:$0xff]  ;;  %v206_v31 = vld [vmem:[%s696_s6 + $0x8] sm:$0xff]  ;;  %193 = vmatpush.msrb.mxu3 %v179_v29  ;;  %v205_v33 = vld [vmem:[%s696_s6] sm:$0xff]  ;;  %vm312_vm9 = vcmask 122880   ;;  %s345_s26 = sshll.u32 %s701_s11, 4  ;;  %s484_s30 = smov [#allocation6]   ;;  %s346_s26 = int_to_ptr.hbm [resolvable:$true] %s345_s26 }
   0xa   :  { %90 = vmatpush.msrb.mxu1 %v74_v6  ;;  %v177_v32 = vld [vmem:[%s695_s5 + $0x28] sm:$0xff]  ;;  %v176_v34 = vld [vmem:[%s695_s5 + $0x20] sm:$0xff]  ;;  %v175_v35 = vld [vmem:[%s695_s5 + $0x18] sm:$0xff]  ;;  %s485_s11 = smov [#allocation2]   ;;  %s334_s15 = sshll.u32 %s700_s10, 4  ;;  %s335_s15 = int_to_ptr.hbm [resolvable:$true] %s334_s15 }
   0xb   :  { %194 = vmatpush.msrb.mxu3 %v178_v30  ;;  %v174_v36 = vld [vmem:[%s695_s5 + $0x10] sm:$0xff]  ;;  %v173_v37 = vld [vmem:[%s695_s5 + $0x8] sm:$0xff]  ;;  %v172_v39 = vld [vmem:[%s695_s5] sm:$0xff]  ;;  %s356_s5 = sshll.u32 %s702_s12, 4  ;;  %s357_s5 = int_to_ptr.hbm [resolvable:$true] %s356_s5 }
   0xc   :  { %91 = vmatpush.msrb.mxu1 %v73_v7  ;;  %v209_v41 = vld [vmem:[%s697_s7 + $0x1] sm:$0x1]  ;;  %v42_v44 = vld [vmem:[%s690_s0] sm:$0x1]  ;;  %s482_s0 = smov 96   ;;  %v286_v6 = vld [vmem:[%s698_s8 + $0x30] sm:$0xff] }
   0xd   :  { %195 = vmatpush.msrb.mxu3 %v177_v32  ;;  %v180_v47 = vld [vmem:[%s697_s7] sm:$0x1]  ;;  %v285_v7 = vld [vmem:[%s698_s8 + $0x28] sm:$0xff]  ;;  %s332_s7 = sshll.u32 %s485_s11, 4  ;;  %s333_s7 = int_to_ptr.vmem [resolvable:$true] %s332_s7 }
   0xe   :  { %92 = vmatpush.msrb.mxu1 %v72_v8  ;;  %v284_v8 = vld [vmem:[%s698_s8 + $0x20] sm:$0xff] }
   0xf   :  { %196 = vmatpush.msrb.mxu3 %v176_v34 }
  0x10   :  { %93 = vmatpush.msrb.mxu1 %v71_v9  ;;  %v283_v9 = vld [vmem:[%s698_s8 + $0x18] sm:$0xff] }
  0x11   :  { %375 = vmatmul.msk.f32.vlgmr.msrb.gmra.mxu1 %vm47_vm0, %v41_v3  ;;  %197 = vmatpush.msrb.mxu3 %v175_v35 }
  0x13   :  { %198 = vmatpush.msrb.mxu3 %v174_v36 }
  0x15   :  { %199 = vmatpush.msrb.mxu3 %v173_v37 }
  0x17   :  { %200 = vmatpush.msrb.mxu3 %v172_v39 }
  0x86   :  { %v68_v10 = vpop.f32.mrf.mxu1 }
  0x87   :  { %v98_v11 = vperm.slane %v68_v10, 0  ;;  %v282_v10 = vld [vmem:[%s698_s8 + $0x10] sm:$0xff] }
  0x8e   :  { %v95_v13 = vpop.f32.mrf.mxu1 }
  0x8f   :  { %v99_v14 = vadd.f32 %v98_v11, %v95_v13  ;;  %v281_v11 = vld [vmem:[%s698_s8 + $0x8] sm:$0xff] }
  0x91   :  { %v102_v15 = vadd.f32 %v389_v12, %v99_v14 }
  0x93   :  { %376 = vmatpush.xpose.msk.msra.mxu2 %vm47_vm0, %v102_v15 }
  0x96   :  { %377 = vmatmul.msk.f32.vlgmr.msra.gmra.mxu2 %vm47_vm0, %v103_v16 }
  0x97   :  { %222 = vmatpush.msrb.mxu2 %v208_v27 }
  0x99   :  { %223 = vmatpush.msrb.mxu2 %v207_v28 }
  0x9b   :  { %224 = vmatpush.msrb.mxu2 %v206_v31 }
  0x9d   :  { %225 = vmatpush.msrb.mxu2 %v205_v33 }
  0x9e   :  { %380 = vmatmul.msk.f32.vlgmr.msrb.gmra.mxu2 %vm47_vm0, %v569_v5  ;;  %v287_v5 = vld [vmem:[%s698_s8 + $0x38] sm:$0xff] }
  0x9f   :  { %300 = vmatpush.msra.mxu0 %v287_v5 }
  0xa1   :  { %301 = vmatpush.msra.mxu0 %v286_v6 }
  0xa3   :  { %302 = vmatpush.msra.mxu0 %v285_v7 }
  0xa5   :  { %303 = vmatpush.msra.mxu0 %v284_v8 }
  0xa7   :  { %304 = vmatpush.msra.mxu0 %v283_v9 }
  0xa9   :  { %305 = vmatpush.msra.mxu0 %v282_v10 }
  0xab   :  { %306 = vmatpush.msra.mxu0 %v281_v11 }
 0x119   :  { %v127_v17 = vpop.f32.mrf.mxu2 }
 0x11a   :  { %v131_v18 = vsel %vm130_vm1, %v127_v17, -inf }
 0x11b   :  { %132 = vmax.xlane.f32.xlu0 %v131_v18  ;;  %v280_v18 = vld [vmem:[%s698_s8] sm:$0xff] }
 0x11c   :  { %307 = vmatpush.msra.mxu0 %v280_v18 }
 0x121   :  { %v227_v42 = vpop.f32.mrf.mxu2 }
 0x122   :  { %v228_v43 = vadd.f32 %v227_v42, %v209_v41 }
 0x18e   :  { %v133_v19 = vpop.xlane.xlu0 %132 }
 0x18f   :  { %v134_v20 = vsub.f32 %v127_v17, %v133_v19 }
 0x191   :  { %v135_v21 = vmul.f32 1.442695, %v134_v20 }
 0x193   :  { %390 = vpow2.f32 %v135_v21  ;;  %v288_v21 = vld [vmem:[%s699_s9] sm:$0x1] }
 0x199   :  { %v391_v22 = vpop.eup %390 }
 0x19a   :  { %v137_v23 = vsel %vm130_vm1, %v391_v22, 0.0 }
 0x19b   :  { %138 = vadd.xlane.f32.xlu0 %v137_v23 }
 0x1af   :  { %268 = vrot.lane.b32.xlu0 %v267_v40, %s480_s24 }
 0x20e   :  { %v139_v24 = vpop.xlane.xlu0 %138 }
 0x20f   :  { %392 = vrcp.f32 %v139_v24 }
 0x215   :  { %v393_v25 = vpop.eup %392 }
 0x216   :  { %v141_v26 = vmul.f32 %v393_v25, %v391_v22 }
 0x218   :  { %378 = vmatmul.msk.f32.vlgmr.msra.gmra.mxu3 %vm143_vm2, %v141_v26  ;;  %142 = vst.msk [vmem:[#allocation6] sm:$0x1] %vm130_vm1, %v141_v26 }
 0x221   :  { %v269_v12 = vpop.permute.xlu0 %268 }
 0x29b   :  { %v164_v38 = vpop.f32.mrf.mxu3 }
 0x29c   :  { %168 = vrot.lane.b32.xlu1 %v164_v38, %s480_s24 }
 0x2a4   :  { %251 = vrot.lane.b32.xlu1 %v228_v43, %s481_s27 }
 0x30e   :  { %v169_v45 = vpop.permute.xlu1 %168 }
 0x30f   :  { %v171_v46 = vsel %vm47_vm0, %v42_v44, %v169_v45 }
 0x310   :  { %379 = vmatmul.msk.f32.vlgmr.msrb.gmra.mxu3 %vm181_vm3, %v171_v46 }
 0x316   :  { %v252_v62 = vpop.permute.xlu1 %251 }
 0x393   :  { %v202_v48 = vpop.f32.mrf.mxu3 }
 0x394   :  { %v203_v49 = vadd.f32 %v202_v48, %v180_v47 }
 0x396   :  { %v230_v50 = vadd.f32 %v228_v43, %v203_v49 }
 0x398   :  { %v381_v51 = vmul.f32 -1.442695, %v230_v50 }
 0x39a   :  { %394 = vpow2.f32 %v381_v51 }
 0x3a0   :  { %v395_v52 = vpop.eup %394 }
 0x3a1   :  { %v234_v53 = vadd.f32 1.0, %v395_v52 }
 0x3a3   :  { %396 = vrcp.f32 %v234_v53  ;;  %v246_v57 = vand.u32 2147483648, %v234_v53  ;;  %v244_v59 = vand.u32 2147483647, %v234_v53  ;;  %vm240_vm5 = vweird.f32 %v234_v53 }
 0x3a5   :  { %v247_v61 = vor.u32 1.1754944e-38, %v246_v57  ;;  %vm245_vm7 = vcmp.eq.f32.partialorder %v244_v59, 8.507059e+37 }
 0x3a9   :  { %v397_v54 = vpop.eup %396 }
 0x3aa   :  { %v236_v55 = vmul.f32 %v397_v54, %v234_v53  ;;  %vm241_vm4 = vweird.f32 %v397_v54 }
 0x3ab   :  { %vm242_vm6 = vmor %vm240_vm5, %vm241_vm4 }
 0x3ac   :  { %v237_v56 = vsub.f32 1.0, %v236_v55 }
 0x3ae   :  { %v238_v58 = vmul.f32 %v397_v54, %v237_v56 }
 0x3b0   :  { %v239_v60 = vadd.f32 %v397_v54, %v238_v58 }
 0x3b2   :  { %v243_v63 = vsel %vm242_vm6, %v397_v54, %v239_v60 }
 0x3b3   :  { %v248_v0 = vsel %vm245_vm7, %v247_v61, %v243_v63 }
 0x3b4   :  { %v254_v1 = vmul.f32 %v252_v62, %v248_v0  ;;  %v261_v13 = vsub.f32 1.0, %v248_v0  ;;  %v271_v15 = vmul.f32 %v269_v12, %v248_v0 }
 0x3b6   :  { %256 = vrot.lane.b32.xlu2 %v254_v1, %s481_s27  ;;  %s483_s27 = smov [#allocation4]  }
 0x3b7   :  { %s343_s28 = sshll.u32 %s483_s27, 4  ;;  %s344_s28 = int_to_ptr.vmem [resolvable:$true] %s343_s28 }
 0x410   :  { %v257_v2 = vpop.permute.xlu2 %256 }
 0x411   :  { %v259_v3 = vadd.f32 %v257_v2, %v203_v49 }
 0x413   :  { %398 = vtanh.f32 %v259_v3 }
 0x419   :  { %v399_v4 = vpop.eup %398 }
 0x41a   :  { %263 = vrot.lane.b32.xlu2 %v399_v4, %s482_s0 }
 0x474   :  { %v264_v14 = vpop.permute.xlu2 %263 }
 0x475   :  { %v266_v16 = vmul.f32 %v264_v14, %v261_v13 }
 0x477   :  { %v272_v17 = vadd.f32 %v271_v15, %v266_v16 }
 0x479   :  { %274 = vrot.lane.b32.xlu1 %v272_v17, %s482_s0  ;;  %s354_s0 = sshll.u32 %s484_s30, 4  ;;  %s355_s0 = int_to_ptr.vmem [resolvable:$true] %s354_s0 }
 0x4eb   :  { %v275_v19 = vpop.permute.xlu1 %274 }
 0x4ec   :  { %278 = vst.msk [vmem:[#allocation4] sm:$0x1] %vm277_vm8, %v275_v19  ;;  %v279_v20 = vsel %vm47_vm0, %v275_v19, %v169_v45 }
 0x4ed   :  { %382 = vmatmul.msk.f32.vlgmr.msra.gmra.mxu0 %vm181_vm3, %v279_v20  ;;  %348 = dma.vmem_to_hbm [thread:$0]  %s344_s28, 16, %s346_s26, [#allocation5]  }
 0x4ee   :  { %359 = dma.vmem_to_hbm [thread:$0]  %s355_s0, 16, %s357_s5, [#allocation5]  }
 0x56a   :  { %v309_v22 = vpop.f32.mrf.mxu0 }
 0x56b   :  { %v310_v23 = vadd.f32 %v309_v22, %v288_v21 }
 0x56d   :  { %v313_v24 = vsel %vm312_vm9, %v310_v23, -inf }
 0x56e   :  { %314 = vmax.xlane.f32.xlu2 %v313_v24 }
 0x5e1   :  { %v315_v25 = vpop.xlane.xlu2 %314 }
 0x5e2   :  { %v316_v26 = vsub.f32 %v310_v23, %v315_v25 }
 0x5e4   :  { %v317_v27 = vmul.f32 1.442695, %v316_v26 }
 0x5e6   :  { %400 = vpow2.f32 %v317_v27 }
 0x5ec   :  { %v401_v28 = vpop.eup %400 }
 0x5ed   :  { %v319_v29 = vsel %vm312_vm9, %v401_v28, 0.0 }
 0x5ee   :  { %320 = vadd.xlane.f32.xlu1 %v319_v29 }
 0x661   :  { %v321_v30 = vpop.xlane.xlu1 %320 }
 0x662   :  { %402 = vlog2.f32 %v321_v30 }
 0x668   :  { %v403_v31 = vpop.eup %402 }
 0x669   :  { %v323_v32 = vmul.f32 0.6931472, %v403_v31 }
 0x66b   :  { %v324_v33 = vadd.f32 %v323_v32, %v315_v25 }
 0x66d   :  { %v325_v34 = vsub.f32 %v310_v23, %v324_v33 }
 0x66f   :  { %326 = vst.msk [vmem:[#allocation2] sm:$0x1] %vm312_vm9, %v325_v34 }
 0x670   :  { %337 = dma.vmem_to_hbm [thread:$0]  %s333_s7, 16, %s335_s15, [#allocation3]  }
 0x671   :  { %476 = dma.done.wait [#allocation3], 16  }
 0x672   :  { %477 = vsyncadd [#allocation3], 4294967280 }
 0x673   :  { %478 = dma.done.wait [#allocation5], 32  }
 0x674   :  { %479 = vsyncadd [#allocation5], 4294967264 }
 0x675   :  { %372 = vsyncpa [#allocation3], 1 }
 0x676   :  { %373 = vsyncpa [#allocation5], 1 }

</bundles_post_ra>
